<compile_context>
chip_gen: v6e
topology: v6e:2x2x1
jax: 0.10.0
libtpu: 0.0.40
codegen_flags: <defaults>
</compile_context>

<pallas_src>
import jax
import jax.numpy as jnp
from jax.experimental import pallas as pl
from jax.experimental.pallas import tpu as pltpu


def _hw_params():
    """Generation-dependent (vmem_limit_bytes, tile_m)."""
    kind = ""
    try:
        kind = jax.devices()[0].device_kind.lower()
    except Exception:
        pass
    if "v7" in kind:                      # 64 MiB physical VMEM: stay conservative
        return 32 * 1024 * 1024, 256
    return 64 * 1024 * 1024, 512          # v5e / v6e: 128 MiB physical VMEM


_VMEM_LIMIT, _TILE_M = _hw_params()


def _round_up(x, m):
    return ((x + m - 1) // m) * m


# ----------------------------------------------------------------------------
# Kernel 1: fused encoder projections + arc/label MLPs, tiled over M = B*S.
# Emits four separate outputs (no XLA concat-slice copies afterwards).
# ----------------------------------------------------------------------------
def _encoder_mlp_kernel(x_ref, wt1_ref, bt1_ref, wt2_ref, bt2_ref,
                        wah_ref, bah_ref, wad_ref, bad_ref,
                        wlh_ref, blh_ref, wld_ref, bld_ref,
                        ha_ref, da_ref, hl_ref, dl_ref):
    x = x_ref[...]                                                   # [TM, E] bf16
    t1 = jnp.dot(x, wt1_ref[...], preferred_element_type=jnp.float32) + bt1_ref[...]
    t2 = jnp.dot(x, wt2_ref[...], preferred_element_type=jnp.float32) + bt2_ref[...]
    t1 = t1.astype(jnp.bfloat16)
    t2 = t2.astype(jnp.bfloat16)
    ha = jnp.dot(t1, wah_ref[...], preferred_element_type=jnp.float32) + bah_ref[...]
    da = jnp.dot(t2, wad_ref[...], preferred_element_type=jnp.float32) + bad_ref[...]
    hl = jnp.dot(t1, wlh_ref[...], preferred_element_type=jnp.float32) + blh_ref[...]
    dl = jnp.dot(t2, wld_ref[...], preferred_element_type=jnp.float32) + bld_ref[...]
    ha_ref[...] = jnp.maximum(ha, 0.0).astype(ha_ref.dtype)
    da_ref[...] = jnp.maximum(da, 0.0).astype(da_ref.dtype)
    hl_ref[...] = jnp.maximum(hl, 0.0).astype(hl_ref.dtype)
    dl_ref[...] = jnp.maximum(dl, 0.0).astype(dl_ref.dtype)


def fused_encoder_mlp(x, wt1, bt1, wt2, bt2,
                      wah, bah, wad, bad, wlh, blh, wld, bld,
                      tile_m=_TILE_M):
    """x: [M, E] bf16 -> (h_arc, d_arc, h_lab, d_lab): [M, Da]/[M, Dl] bf16."""
    M, E = x.shape
    Da = wah.shape[1]
    Dl = wlh.shape[1]
    tm = min(tile_m, _round_up(M, 8))
    grid = (pl.cdiv(M, tm),)

    def wspec(w):
        return pl.BlockSpec(w.shape, lambda i: (0, 0))

    ha, da, hl, dl = pl.pallas_call(
        _encoder_mlp_kernel,
        out_shape=(jax.ShapeDtypeStruct((M, Da), jnp.bfloat16),
                   jax.ShapeDtypeStruct((M, Da), jnp.bfloat16),
                   jax.ShapeDtypeStruct((M, Dl), jnp.bfloat16),
                   jax.ShapeDtypeStruct((M, Dl), jnp.bfloat16)),
        grid=grid,
        in_specs=[
            pl.BlockSpec((tm, E), lambda i: (i, 0)),
            wspec(wt1), wspec(bt1), wspec(wt2), wspec(bt2),
            wspec(wah), wspec(bah), wspec(wad), wspec(bad),
            wspec(wlh), wspec(blh), wspec(wld), wspec(bld),
        ],
        out_specs=(pl.BlockSpec((tm, Da), lambda i: (i, 0)),
                   pl.BlockSpec((tm, Da), lambda i: (i, 0)),
                   pl.BlockSpec((tm, Dl), lambda i: (i, 0)),
                   pl.BlockSpec((tm, Dl), lambda i: (i, 0))),
        compiler_params=pltpu.CompilerParams(
            dimension_semantics=("parallel",),
            vmem_limit_bytes=_VMEM_LIMIT),
    )(x, wt1, bt1, wt2, bt2, wah, bah, wad, bad, wlh, blh, wld, bld)
    return ha, da, hl, dl


# ----------------------------------------------------------------------------
# Kernel 2: arc biaffine + masked log-softmax + gold-head gather + per-batch
# masked loss reduction (scalar output -> no lane-sparse HBM writeback).
# ----------------------------------------------------------------------------
def _arc_loss_kernel(d_ref, h_ref, wcc_ref, wrow_ref, heads_ref, valid_ref,
                     tmask_ref, out_ref):
    d = d_ref[0]                                                     # [S, Da] bf16
    h = h_ref[0]                                                     # [S, Da] bf16
    tmp = jnp.dot(d, wcc_ref[...], preferred_element_type=jnp.float32) + wrow_ref[...]
    s = jax.lax.dot_general(                                          # [S, S] f32
        tmp.astype(jnp.bfloat16), h,
        dimension_numbers=(((1,), (1,)), ((), ())),
        preferred_element_type=jnp.float32)
    valid = valid_ref[0]                                             # [1, S]
    s = jnp.where(valid > 0.0, s, -1e9)
    m = jnp.max(s, axis=-1, keepdims=True)
    lse = jnp.log(jnp.sum(jnp.exp(s - m), axis=-1, keepdims=True)) + m
    lp = s - lse                                                     # [S, S]
    heads_col = heads_ref[0]                                         # [S, 1] i32
    col_ids = jax.lax.broadcasted_iota(jnp.int32, lp.shape, 1)
    gold = jnp.sum(jnp.where(col_ids == heads_col, lp, 0.0),
                   axis=-1, keepdims=True)                           # [S, 1]
    out_ref[0] = jnp.sum(gold * tmask_ref[0], axis=0, keepdims=True)  # [1, 1]


def arc_gold_logprob_sums(d_arc, h_arc, w_cc, w_row, heads3, valid3, tmask3):
    """Per-batch sum of token_mask * log P(gold head): [B]."""
    B, S, Da = d_arc.shape
    out = pl.pallas_call(
        _arc_loss_kernel,
        out_shape=jax.ShapeDtypeStruct((B, 1, 1), jnp.float32),
        grid=(B,),
        in_specs=[
            pl.BlockSpec((1, S, Da), lambda b: (b, 0, 0)),
            pl.BlockSpec((1, S, Da), lambda b: (b, 0, 0)),
            pl.BlockSpec((Da, Da), lambda b: (0, 0)),
            pl.BlockSpec((1, Da), lambda b: (0, 0)),
            pl.BlockSpec((1, S, 1), lambda b: (b, 0, 0)),
            pl.BlockSpec((1, 1, S), lambda b: (b, 0, 0)),
            pl.BlockSpec((1, S, 1), lambda b: (b, 0, 0)),
        ],
        out_specs=pl.BlockSpec((1, 1, 1), lambda b: (b, 0, 0)),
        compiler_params=pltpu.CompilerParams(
            dimension_semantics=("parallel",),
            vmem_limit_bytes=_VMEM_LIMIT),
    )(d_arc, h_arc, w_cc, w_row, heads3, valid3, tmask3)
    return out.reshape(B)


# ----------------------------------------------------------------------------
# Kernel 3: label biaffine restricted to gold head, ALL labels in one matmul
# per sentence (grid=(B,)), gold-head gather via one-hot MXU matmul,
# label log-softmax + gold-label gather + masked loss reduce fused in-kernel.
# ----------------------------------------------------------------------------
def _label_loss_kernel(d_ref, h_ref, heads_ref, uflat_ref, udep_ref, uhead_ref,
                       ucorner_ref, labels_ref, tmask_ref, out_ref):
    d = d_ref[0]                                                     # [S, Dl] bf16
    h = h_ref[0]                                                     # [S, Dl] bf16
    S, Dl = d.shape
    L = udep_ref.shape[1]
    # Gold-head gather fused in-kernel: one-hot(heads) @ h on the MXU.
    heads_col = heads_ref[0]                                         # [S, 1] i32
    col_ids = jax.lax.broadcasted_iota(jnp.int32, (S, S), 1)
    onehot = (col_ids == heads_col).astype(jnp.bfloat16)             # [S, S]
    hg = jnp.dot(onehot, h, preferred_element_type=jnp.float32)      # [S, Dl] f32
    hg_bf = hg.astype(jnp.bfloat16)
    # Bilinear core for ALL labels: one [S,Dl] @ [Dl, L*Dl] matmul.
    t = jnp.dot(d, uflat_ref[...], preferred_element_type=jnp.float32)  # [S, L*Dl]
    core = jnp.sum(t.reshape(S, L, Dl) * hg[:, None, :], axis=-1)    # [S, L]
    db = jnp.dot(d, udep_ref[...], preferred_element_type=jnp.float32)      # [S, L]
    hb = jnp.dot(hg_bf, uhead_ref[...], preferred_element_type=jnp.float32)  # [S, L]
    scores = core + db + hb + ucorner_ref[...]                       # [S, L]
    # log-softmax over labels (lane axis) + gold-label gather + masked reduce.
    m = jnp.max(scores, axis=-1, keepdims=True)
    lse = jnp.log(jnp.sum(jnp.exp(scores - m), axis=-1, keepdims=True)) + m
    lp = scores - lse
    lab_col = labels_ref[0]                                          # [S, 1] i32
    lab_ids = jax.lax.broadcasted_iota(jnp.int32, lp.shape, 1)
    gold = jnp.sum(jnp.where(lab_ids == lab_col, lp, 0.0),
                   axis=-1, keepdims=True)                           # [S, 1]
    out_ref[0] = jnp.sum(gold * tmask_ref[0], axis=0, keepdims=True)  # [1, 1]


def label_gold_logprob_sums(d_lab, h_lab, heads3, u_flat, u_dep_w, u_head_w,
                            u_corner, labels3, tmask3):
    """Per-batch sum of token_mask * log P(gold label | gold head): [B]."""
    B, S, Dl = d_lab.shape
    L = u_dep_w.shape[1]
    out = pl.pallas_call(
        _label_loss_kernel,
        out_shape=jax.ShapeDtypeStruct((B, 1, 1), jnp.float32),
        grid=(B,),
        in_specs=[
            pl.BlockSpec((1, S, Dl), lambda b: (b, 0, 0)),
            pl.BlockSpec((1, S, Dl), lambda b: (b, 0, 0)),
            pl.BlockSpec((1, S, 1), lambda b: (b, 0, 0)),
            pl.BlockSpec((Dl, L * Dl), lambda b: (0, 0)),
            pl.BlockSpec((Dl, L), lambda b: (0, 0)),
            pl.BlockSpec((Dl, L), lambda b: (0, 0)),
            pl.BlockSpec((1, L), lambda b: (0, 0)),
            pl.BlockSpec((1, S, 1), lambda b: (b, 0, 0)),
            pl.BlockSpec((1, S, 1), lambda b: (b, 0, 0)),
        ],
        out_specs=pl.BlockSpec((1, 1, 1), lambda b: (b, 0, 0)),
        compiler_params=pltpu.CompilerParams(
            dimension_semantics=("parallel",),
            vmem_limit_bytes=_VMEM_LIMIT),
    )(d_lab, h_lab, heads3, u_flat, u_dep_w, u_head_w, u_corner, labels3, tmask3)
    return out.reshape(B)


# ----------------------------------------------------------------------------
# Parser (forward returns the scalar training loss, like the nn.Module)
# ----------------------------------------------------------------------------
class PallasParser:
    def __init__(self, vocab, pos_vocab, emb_dim, hidden, arc_dim, lab_dim,
                 n_label, key):
        ks = jax.random.split(key, 10)
        s = 0.1
        self.arc_dim = arc_dim
        self.lab_dim = lab_dim
        self.n_label = n_label

        self.word_emb = s * jax.random.normal(ks[0], (vocab, emb_dim), jnp.float32)
        self.pos_emb = s * jax.random.normal(ks[1], (pos_vocab, emb_dim), jnp.float32)

        # "encoder": two linear projections producing trans1 / trans2.
        w_t1 = s * jax.random.normal(ks[2], (emb_dim, hidden), jnp.float32)
        w_t2 = s * jax.random.normal(ks[3], (emb_dim, hidden), jnp.float32)
        # Biaffine-scorer MLPs (ReLU).
        w_arc_h = s * jax.random.normal(ks[4], (hidden, arc_dim), jnp.float32)
        w_arc_d = s * jax.random.normal(ks[5], (hidden, arc_dim), jnp.float32)
        w_lab_h = s * jax.random.normal(ks[6], (hidden, lab_dim), jnp.float32)
        w_lab_d = s * jax.random.normal(ks[7], (hidden, lab_dim), jnp.float32)
        # Biaffine weights (dep side carries the arc bias row; label biaffine
        # has both bias columns plus a corner).
        w_arc = s * jax.random.normal(ks[8], (arc_dim + 1, arc_dim), jnp.float32)
        u_lab = s * jax.random.normal(
            ks[9], (n_label, lab_dim + 1, lab_dim + 1), jnp.float32)

        # ---- bf16 matmul operands / fp32 biases --------------------------------
        self.w_t1_bf = w_t1.astype(jnp.bfloat16)
        self.w_t2_bf = w_t2.astype(jnp.bfloat16)
        self.b_t1 = jnp.zeros((1, hidden), jnp.float32)
        self.b_t2 = jnp.zeros((1, hidden), jnp.float32)
        self.w_arc_h_bf = w_arc_h.astype(jnp.bfloat16)
        self.w_arc_d_bf = w_arc_d.astype(jnp.bfloat16)
        self.w_lab_h_bf = w_lab_h.astype(jnp.bfloat16)
        self.w_lab_d_bf = w_lab_d.astype(jnp.bfloat16)
        self.b_arc_h = jnp.zeros((1, arc_dim), jnp.float32)
        self.b_arc_d = jnp.zeros((1, arc_dim), jnp.float32)
        self.b_lab_h = jnp.zeros((1, lab_dim), jnp.float32)
        self.b_lab_d = jnp.zeros((1, lab_dim), jnp.float32)

        # Arc biaffine split: [Da, Da] core + dep-side bias row.
        self.w_arc_cc_bf = w_arc[:arc_dim, :].astype(jnp.bfloat16)       # [Da, Da]
        self.w_arc_row = w_arc[arc_dim:arc_dim + 1, :]                   # [1, Da] f32

        # Label biaffine: core re-laid-out once as [Dl, L*Dl] so the kernel
        # does a single big matmul per sentence, plus rank-1 bias mats + corner.
        u_cc = u_lab[:, :lab_dim, :lab_dim]                              # [L, Dl, Dl]
        self.u_flat_bf = jnp.transpose(u_cc, (1, 0, 2)).reshape(
            lab_dim, n_label * lab_dim).astype(jnp.bfloat16)             # [Dl, L*Dl]
        self.u_dep_w_bf = jnp.transpose(
            u_lab[:, :lab_dim, lab_dim]).astype(jnp.bfloat16)            # [Dl, L]
        self.u_head_w_bf = jnp.transpose(
            u_lab[:, lab_dim, :lab_dim]).astype(jnp.bfloat16)            # [Dl, L]
        self.u_corner = u_lab[:, lab_dim, lab_dim].reshape(1, n_label)   # [1, L]
        # TODO(synk): dropout from the original BiaffineScorer is omitted
        # (deterministic forward / eval semantics).

    def forward(self, words, index_ids, last_index_position, postags, chars,
                heads, labels, masks, lengths):
        # index_ids / last_index_position / chars are consumed only by the
        # original subword/char encoder.
        # TODO(synk): char-CNN / subword pooling encoder branch not translated.
        B, S = words.shape
        Da, Dl = self.arc_dim, self.lab_dim

        emb = self.word_emb[words] + self.pos_emb[postags]               # [B, S, E]
        flat = emb.reshape(B * S, -1).astype(jnp.bfloat16)

        h_arc, d_arc, h_lab, d_lab = fused_encoder_mlp(
            flat, self.w_t1_bf, self.b_t1, self.w_t2_bf, self.b_t2,
            self.w_arc_h_bf, self.b_arc_h, self.w_arc_d_bf, self.b_arc_d,
            self.w_lab_h_bf, self.b_lab_h, self.w_lab_d_bf, self.b_lab_d)

        h_arc = h_arc.reshape(B, S, Da)
        d_arc = d_arc.reshape(B, S, Da)
        h_lab = h_lab.reshape(B, S, Dl)
        d_lab = d_lab.reshape(B, S, Dl)

        heads3 = heads.astype(jnp.int32).reshape(B, S, 1)
        labels3 = labels.astype(jnp.int32).reshape(B, S, 1)
        valid = masks.astype(jnp.float32)                                # 1 = real token
        valid3 = valid.reshape(B, 1, S)
        token_mask = valid * (jnp.arange(S) > 0).astype(jnp.float32)[None, :]
        tmask3 = token_mask.reshape(B, S, 1)
        denom = jnp.maximum(token_mask.sum(), 1.0)

        arc_sums = arc_gold_logprob_sums(
            d_arc, h_arc, self.w_arc_cc_bf, self.w_arc_row,
            heads3, valid3, tmask3)                                      # [B]
        lab_sums = label_gold_logprob_sums(
            d_lab, h_lab, heads3, self.u_flat_bf, self.u_dep_w_bf,
            self.u_head_w_bf, self.u_corner, labels3, tmask3)            # [B]

        return -(arc_sums.sum() + lab_sums.sum()) / denom


if __name__ == "__main__":
    B, S = 2, 8
    VOCAB, POS_VOCAB = 50, 10
    EMB, HID, ARC_DIM, LAB_DIM, N_LABEL = 32, 32, 32, 32, 5

    key = jax.random.PRNGKey(0)
    k_w, k_p, k_h, k_l = jax.random.split(key, 4)

    words = jax.random.randint(k_w, (B, S), 0, VOCAB)
    postags = jax.random.randint(k_p, (B, S), 0, POS_VOCAB)
    heads = jax.random.randint(k_h, (B, S), 0, S)
    labels = jax.random.randint(k_l, (B, S), 0, N_LABEL)
    lengths = jnp.array([8, 6], jnp.int32)
    masks = (jnp.arange(S)[None, :] < lengths[:, None]).astype(jnp.float32)
    index_ids = jnp.arange(B * S).reshape(B, S)            # unused (subword enc)
    last_index_position = lengths                           # unused (subword enc)
    chars = jnp.zeros((B, S, 4), jnp.int32)                 # unused (char enc)

    parser = PallasParser(VOCAB, POS_VOCAB, EMB, HID, ARC_DIM, LAB_DIM,
                          N_LABEL, jax.random.PRNGKey(42))

    loss = parser.forward(words, index_ids, last_index_position, postags,
                          chars, heads, labels, masks, lengths)
    jax.block_until_ready(loss)
    assert loss.shape == () and jnp.isfinite(loss)
    print("KERNEL_OK")
</pallas_src>

<mosaic_0001>
module attributes {stable_mosaic.version = 11 : i64} {
  func.func @_encoder_mlp_kernel(%arg0: i32, %arg1: memref<16x32xbf16, #tpu.memory_space<vmem>>, %arg2: memref<32x32xbf16, #tpu.memory_space<vmem>>, %arg3: memref<1x32xf32, #tpu.memory_space<vmem>>, %arg4: memref<32x32xbf16, #tpu.memory_space<vmem>>, %arg5: memref<1x32xf32, #tpu.memory_space<vmem>>, %arg6: memref<32x32xbf16, #tpu.memory_space<vmem>>, %arg7: memref<1x32xf32, #tpu.memory_space<vmem>>, %arg8: memref<32x32xbf16, #tpu.memory_space<vmem>>, %arg9: memref<1x32xf32, #tpu.memory_space<vmem>>, %arg10: memref<32x32xbf16, #tpu.memory_space<vmem>>, %arg11: memref<1x32xf32, #tpu.memory_space<vmem>>, %arg12: memref<32x32xbf16, #tpu.memory_space<vmem>>, %arg13: memref<1x32xf32, #tpu.memory_space<vmem>>, %arg14: memref<16x32xbf16, #tpu.memory_space<vmem>>, %arg15: memref<16x32xbf16, #tpu.memory_space<vmem>>, %arg16: memref<16x32xbf16, #tpu.memory_space<vmem>>, %arg17: memref<16x32xbf16, #tpu.memory_space<vmem>>) attributes {dimension_semantics = [#tpu.dimension_semantics<parallel>], iteration_bounds = array<i64: 1>, scalar_prefetch = 0 : i64, scratch_operands = 0 : i64, tpu.core_type = #tpu.core_type<tc>, window_params = [{transform_indices = @transform_0, window_bounds = array<i64: 16, 32>}, {pipeline_mode = #tpu.pipeline_mode<synchronous>, transform_indices = @transform_1, window_bounds = array<i64: 32, 32>}, {pipeline_mode = #tpu.pipeline_mode<synchronous>, transform_indices = @transform_2, window_bounds = array<i64: 1, 32>}, {pipeline_mode = #tpu.pipeline_mode<synchronous>, transform_indices = @transform_3, window_bounds = array<i64: 32, 32>}, {pipeline_mode = #tpu.pipeline_mode<synchronous>, transform_indices = @transform_4, window_bounds = array<i64: 1, 32>}, {pipeline_mode = #tpu.pipeline_mode<synchronous>, transform_indices = @transform_5, window_bounds = array<i64: 32, 32>}, {pipeline_mode = #tpu.pipeline_mode<synchronous>, transform_indices = @transform_6, window_bounds = array<i64: 1, 32>}, {pipeline_mode = #tpu.pipeline_mode<synchronous>, transform_indices = @transform_7, window_bounds = array<i64: 32, 32>}, {pipeline_mode = #tpu.pipeline_mode<synchronous>, transform_indices = @transform_8, window_bounds = array<i64: 1, 32>}, {pipeline_mode = #tpu.pipeline_mode<synchronous>, transform_indices = @transform_9, window_bounds = array<i64: 32, 32>}, {pipeline_mode = #tpu.pipeline_mode<synchronous>, transform_indices = @transform_10, window_bounds = array<i64: 1, 32>}, {pipeline_mode = #tpu.pipeline_mode<synchronous>, transform_indices = @transform_11, window_bounds = array<i64: 32, 32>}, {pipeline_mode = #tpu.pipeline_mode<synchronous>, transform_indices = @transform_12, window_bounds = array<i64: 1, 32>}, {transform_indices = @transform_13, window_bounds = array<i64: 16, 32>}, {transform_indices = @transform_14, window_bounds = array<i64: 16, 32>}, {transform_indices = @transform_15, window_bounds = array<i64: 16, 32>}, {transform_indices = @transform_16, window_bounds = array<i64: 16, 32>}]} {
    %c0 = arith.constant 0 : index
    %c0_0 = arith.constant 0 : index
    %0 = vector.load %arg1[%c0, %c0_0] : memref<16x32xbf16, #tpu.memory_space<vmem>>, vector<16x32xbf16>
    %c0_1 = arith.constant 0 : index
    %c0_2 = arith.constant 0 : index
    %1 = vector.load %arg2[%c0_1, %c0_2] : memref<32x32xbf16, #tpu.memory_space<vmem>>, vector<32x32xbf16>
    %cst = arith.constant dense<0.000000e+00> : vector<16x32xf32>
    %2 = tpu.matmul %0, %1, %cst {dimension_numbers = #tpu.dot_dimension_numbers<[1], [0], [0], [1], [0, 0, 1, 1], [], []>} : vector<16x32xbf16>, vector<32x32xbf16>, vector<16x32xf32> -> vector<16x32xf32>
    %c0_3 = arith.constant 0 : index
    %c0_4 = arith.constant 0 : index
    %3 = vector.load %arg3[%c0_3, %c0_4] : memref<1x32xf32, #tpu.memory_space<vmem>>, vector<1x32xf32>
    %4 = vector.broadcast %3 : vector<1x32xf32> to vector<16x32xf32>
    %5 = arith.addf %2, %4 : vector<16x32xf32>
    %c0_5 = arith.constant 0 : index
    %c0_6 = arith.constant 0 : index
    %6 = vector.load %arg4[%c0_5, %c0_6] : memref<32x32xbf16, #tpu.memory_space<vmem>>, vector<32x32xbf16>
    %cst_7 = arith.constant dense<0.000000e+00> : vector<16x32xf32>
    %7 = tpu.matmul %0, %6, %cst_7 {dimension_numbers = #tpu.dot_dimension_numbers<[1], [0], [0], [1], [0, 0, 1, 1], [], []>} : vector<16x32xbf16>, vector<32x32xbf16>, vector<16x32xf32> -> vector<16x32xf32>
    %c0_8 = arith.constant 0 : index
    %c0_9 = arith.constant 0 : index
    %8 = vector.load %arg5[%c0_8, %c0_9] : memref<1x32xf32, #tpu.memory_space<vmem>>, vector<1x32xf32>
    %9 = vector.broadcast %8 : vector<1x32xf32> to vector<16x32xf32>
    %10 = arith.addf %7, %9 : vector<16x32xf32>
    %11 = arith.truncf %5 : vector<16x32xf32> to vector<16x32xbf16>
    %12 = arith.truncf %10 : vector<16x32xf32> to vector<16x32xbf16>
    %c0_10 = arith.constant 0 : index
    %c0_11 = arith.constant 0 : index
    %13 = vector.load %arg6[%c0_10, %c0_11] : memref<32x32xbf16, #tpu.memory_space<vmem>>, vector<32x32xbf16>
    %cst_12 = arith.constant dense<0.000000e+00> : vector<16x32xf32>
    %14 = tpu.matmul %11, %13, %cst_12 {dimension_numbers = #tpu.dot_dimension_numbers<[1], [0], [0], [1], [0, 0, 1, 1], [], []>} : vector<16x32xbf16>, vector<32x32xbf16>, vector<16x32xf32> -> vector<16x32xf32>
    %c0_13 = arith.constant 0 : index
    %c0_14 = arith.constant 0 : index
    %15 = vector.load %arg7[%c0_13, %c0_14] : memref<1x32xf32, #tpu.memory_space<vmem>>, vector<1x32xf32>
    %16 = vector.broadcast %15 : vector<1x32xf32> to vector<16x32xf32>
    %17 = arith.addf %14, %16 : vector<16x32xf32>
    %c0_15 = arith.constant 0 : index
    %c0_16 = arith.constant 0 : index
    %18 = vector.load %arg8[%c0_15, %c0_16] : memref<32x32xbf16, #tpu.memory_space<vmem>>, vector<32x32xbf16>
    %cst_17 = arith.constant dense<0.000000e+00> : vector<16x32xf32>
    %19 = tpu.matmul %12, %18, %cst_17 {dimension_numbers = #tpu.dot_dimension_numbers<[1], [0], [0], [1], [0, 0, 1, 1], [], []>} : vector<16x32xbf16>, vector<32x32xbf16>, vector<16x32xf32> -> vector<16x32xf32>
    %c0_18 = arith.constant 0 : index
    %c0_19 = arith.constant 0 : index
    %20 = vector.load %arg9[%c0_18, %c0_19] : memref<1x32xf32, #tpu.memory_space<vmem>>, vector<1x32xf32>
    %21 = vector.broadcast %20 : vector<1x32xf32> to vector<16x32xf32>
    %22 = arith.addf %19, %21 : vector<16x32xf32>
    %c0_20 = arith.constant 0 : index
    %c0_21 = arith.constant 0 : index
    %23 = vector.load %arg10[%c0_20, %c0_21] : memref<32x32xbf16, #tpu.memory_space<vmem>>, vector<32x32xbf16>
    %cst_22 = arith.constant dense<0.000000e+00> : vector<16x32xf32>
    %24 = tpu.matmul %11, %23, %cst_22 {dimension_numbers = #tpu.dot_dimension_numbers<[1], [0], [0], [1], [0, 0, 1, 1], [], []>} : vector<16x32xbf16>, vector<32x32xbf16>, vector<16x32xf32> -> vector<16x32xf32>
    %c0_23 = arith.constant 0 : index
    %c0_24 = arith.constant 0 : index
    %25 = vector.load %arg11[%c0_23, %c0_24] : memref<1x32xf32, #tpu.memory_space<vmem>>, vector<1x32xf32>
    %26 = vector.broadcast %25 : vector<1x32xf32> to vector<16x32xf32>
    %27 = arith.addf %24, %26 : vector<16x32xf32>
    %c0_25 = arith.constant 0 : index
    %c0_26 = arith.constant 0 : index
    %28 = vector.load %arg12[%c0_25, %c0_26] : memref<32x32xbf16, #tpu.memory_space<vmem>>, vector<32x32xbf16>
    %cst_27 = arith.constant dense<0.000000e+00> : vector<16x32xf32>
    %29 = tpu.matmul %12, %28, %cst_27 {dimension_numbers = #tpu.dot_dimension_numbers<[1], [0], [0], [1], [0, 0, 1, 1], [], []>} : vector<16x32xbf16>, vector<32x32xbf16>, vector<16x32xf32> -> vector<16x32xf32>
    %c0_28 = arith.constant 0 : index
    %c0_29 = arith.constant 0 : index
    %30 = vector.load %arg13[%c0_28, %c0_29] : memref<1x32xf32, #tpu.memory_space<vmem>>, vector<1x32xf32>
    %31 = vector.broadcast %30 : vector<1x32xf32> to vector<16x32xf32>
    %32 = arith.addf %29, %31 : vector<16x32xf32>
    %cst_30 = arith.constant 0.000000e+00 : f32
    %33 = vector.broadcast %cst_30 : f32 to vector<16x32xf32>
    %34 = arith.maximumf %17, %33 : vector<16x32xf32>
    %35 = arith.truncf %34 : vector<16x32xf32> to vector<16x32xbf16>
    %c0_31 = arith.constant 0 : index
    %c0_32 = arith.constant 0 : index
    %36 = vector.load %arg14[%c0_31, %c0_32] : memref<16x32xbf16, #tpu.memory_space<vmem>>, vector<16x32xbf16>
    tpu.vector_store %arg14[%c0_31, %c0_32], %35 {strides = array<i32>} : memref<16x32xbf16, #tpu.memory_space<vmem>>, vector<16x32xbf16>,
    %cst_33 = arith.constant 0.000000e+00 : f32
    %37 = vector.broadcast %cst_33 : f32 to vector<16x32xf32>
    %38 = arith.maximumf %22, %37 : vector<16x32xf32>
    %39 = arith.truncf %38 : vector<16x32xf32> to vector<16x32xbf16>
    %c0_34 = arith.constant 0 : index
    %c0_35 = arith.constant 0 : index
    %40 = vector.load %arg15[%c0_34, %c0_35] : memref<16x32xbf16, #tpu.memory_space<vmem>>, vector<16x32xbf16>
    tpu.vector_store %arg15[%c0_34, %c0_35], %39 {strides = array<i32>} : memref<16x32xbf16, #tpu.memory_space<vmem>>, vector<16x32xbf16>,
    %cst_36 = arith.constant 0.000000e+00 : f32
    %41 = vector.broadcast %cst_36 : f32 to vector<16x32xf32>
    %42 = arith.maximumf %27, %41 : vector<16x32xf32>
    %43 = arith.truncf %42 : vector<16x32xf32> to vector<16x32xbf16>
    %c0_37 = arith.constant 0 : index
    %c0_38 = arith.constant 0 : index
    %44 = vector.load %arg16[%c0_37, %c0_38] : memref<16x32xbf16, #tpu.memory_space<vmem>>, vector<16x32xbf16>
    tpu.vector_store %arg16[%c0_37, %c0_38], %43 {strides = array<i32>} : memref<16x32xbf16, #tpu.memory_space<vmem>>, vector<16x32xbf16>,
    %cst_39 = arith.constant 0.000000e+00 : f32
    %45 = vector.broadcast %cst_39 : f32 to vector<16x32xf32>
    %46 = arith.maximumf %32, %45 : vector<16x32xf32>
    %47 = arith.truncf %46 : vector<16x32xf32> to vector<16x32xbf16>
    %c0_40 = arith.constant 0 : index
    %c0_41 = arith.constant 0 : index
    %48 = vector.load %arg17[%c0_40, %c0_41] : memref<16x32xbf16, #tpu.memory_space<vmem>>, vector<16x32xbf16>
    tpu.vector_store %arg17[%c0_40, %c0_41], %47 {strides = array<i32>} : memref<16x32xbf16, #tpu.memory_space<vmem>>, vector<16x32xbf16>,
    return
  }
  func.func @transform_0(%arg0: i32) -> (i32, i32) {
    %c0_i32 = arith.constant 0 : i32
    %c0_i32_0 = arith.constant 0 : i32
    return %arg0, %c0_i32 : i32, i32
  }
  func.func @transform_1(%arg0: i32) -> (i32, i32) {
    %c0_i32 = arith.constant 0 : i32
    %c0_i32_0 = arith.constant 0 : i32
    %c0_i32_1 = arith.constant 0 : i32
    return %c0_i32, %c0_i32_0 : i32, i32
  }
  func.func @transform_2(%arg0: i32) -> (i32, i32) {
    %c0_i32 = arith.constant 0 : i32
    %c0_i32_0 = arith.constant 0 : i32
    %c0_i32_1 = arith.constant 0 : i32
    return %c0_i32, %c0_i32_0 : i32, i32
  }
  func.func @transform_3(%arg0: i32) -> (i32, i32) {
    %c0_i32 = arith.constant 0 : i32
    %c0_i32_0 = arith.constant 0 : i32
    %c0_i32_1 = arith.constant 0 : i32
    return %c0_i32, %c0_i32_0 : i32, i32
  }
  func.func @transform_4(%arg0: i32) -> (i32, i32) {
    %c0_i32 = arith.constant 0 : i32
    %c0_i32_0 = arith.constant 0 : i32
    %c0_i32_1 = arith.constant 0 : i32
    return %c0_i32, %c0_i32_0 : i32, i32
  }
  func.func @transform_5(%arg0: i32) -> (i32, i32) {
    %c0_i32 = arith.constant 0 : i32
    %c0_i32_0 = arith.constant 0 : i32
    %c0_i32_1 = arith.constant 0 : i32
    return %c0_i32, %c0_i32_0 : i32, i32
  }
  func.func @transform_6(%arg0: i32) -> (i32, i32) {
    %c0_i32 = arith.constant 0 : i32
    %c0_i32_0 = arith.constant 0 : i32
    %c0_i32_1 = arith.constant 0 : i32
    return %c0_i32, %c0_i32_0 : i32, i32
  }
  func.func @transform_7(%arg0: i32) -> (i32, i32) {
    %c0_i32 = arith.constant 0 : i32
    %c0_i32_0 = arith.constant 0 : i32
    %c0_i32_1 = arith.constant 0 : i32
    return %c0_i32, %c0_i32_0 : i32, i32
  }
  func.func @transform_8(%arg0: i32) -> (i32, i32) {
    %c0_i32 = arith.constant 0 : i32
    %c0_i32_0 = arith.constant 0 : i32
    %c0_i32_1 = arith.constant 0 : i32
    return %c0_i32, %c0_i32_0 : i32, i32
  }
  func.func @transform_9(%arg0: i32) -> (i32, i32) {
    %c0_i32 = arith.constant 0 : i32
    %c0_i32_0 = arith.constant 0 : i32
    %c0_i32_1 = arith.constant 0 : i32
    return %c0_i32, %c0_i32_0 : i32, i32
  }
  func.func @transform_10(%arg0: i32) -> (i32, i32) {
    %c0_i32 = arith.constant 0 : i32
    %c0_i32_0 = arith.constant 0 : i32
    %c0_i32_1 = arith.constant 0 : i32
    return %c0_i32, %c0_i32_0 : i32, i32
  }
  func.func @transform_11(%arg0: i32) -> (i32, i32) {
    %c0_i32 = arith.constant 0 : i32
    %c0_i32_0 = arith.constant 0 : i32
    %c0_i32_1 = arith.constant 0 : i32
    return %c0_i32, %c0_i32_0 : i32, i32
  }
  func.func @transform_12(%arg0: i32) -> (i32, i32) {
    %c0_i32 = arith.constant 0 : i32
    %c0_i32_0 = arith.constant 0 : i32
    %c0_i32_1 = arith.constant 0 : i32
    return %c0_i32, %c0_i32_0 : i32, i32
  }
  func.func @transform_13(%arg0: i32) -> (i32, i32) {
    %c0_i32 = arith.constant 0 : i32
    %c0_i32_0 = arith.constant 0 : i32
    return %arg0, %c0_i32 : i32, i32
  }
  func.func @transform_14(%arg0: i32) -> (i32, i32) {
    %c0_i32 = arith.constant 0 : i32
    %c0_i32_0 = arith.constant 0 : i32
    return %arg0, %c0_i32 : i32, i32
  }
  func.func @transform_15(%arg0: i32) -> (i32, i32) {
    %c0_i32 = arith.constant 0 : i32
    %c0_i32_0 = arith.constant 0 : i32
    return %arg0, %c0_i32 : i32, i32
  }
  func.func @transform_16(%arg0: i32) -> (i32, i32) {
    %c0_i32 = arith.constant 0 : i32
    %c0_i32_0 = arith.constant 0 : i32
    return %arg0, %c0_i32 : i32, i32
  }
}

</mosaic_0001>

<bundles_post_ra>
// kernel: tpu_custom_call.1
= control target key start
LH: loop header
LB: loop body
LE: loop exit
PB: predicated region body
PF: predicated region fallthrough
CT: control target
= control target key end

     0   :  { %s1362_s0 = inlined_call_operand.hbm [shape: bf16[16,32], index: 0, kind: input, shape index: {}]   ;;  %s1363_s1 = inlined_call_operand.hbm [shape: bf16[32,32], index: 1, kind: input, shape index: {}]   ;;  %s1364_s2 = inlined_call_operand.hbm [shape: f32[1,32], index: 2, kind: input, shape index: {}]   ;;  %s1365_s3 = inlined_call_operand.hbm [shape: bf16[32,32], index: 3, kind: input, shape index: {}]   ;;  %s1366_s4 = inlined_call_operand.hbm [shape: f32[1,32], index: 4, kind: input, shape index: {}]   ;;  %s1367_s5 = inlined_call_operand.hbm [shape: bf16[32,32], index: 5, kind: input, shape index: {}]   ;;  %s1368_s6 = inlined_call_operand.hbm [shape: f32[1,32], index: 6, kind: input, shape index: {}]   ;;  %s1369_s7 = inlined_call_operand.hbm [shape: bf16[32,32], index: 7, kind: input, shape index: {}]   ;;  %s1370_s8 = inlined_call_operand.hbm [shape: f32[1,32], index: 8, kind: input, shape index: {}]   ;;  %s1371_s9 = inlined_call_operand.vmem [shape: bf16[32,32], index: 9, kind: input, shape index: {}]   ;;  %s1372_s10 = inlined_call_operand.vmem [shape: f32[1,32], index: 10, kind: input, shape index: {}]   ;;  %s1373_s11 = inlined_call_operand.hbm [shape: bf16[32,32], index: 11, kind: input, shape index: {}]   ;;  %s1374_s12 = inlined_call_operand.vmem [shape: f32[1,32], index: 12, kind: input, shape index: {}]   ;;  %s1375_s13 = inlined_call_operand.hbm [shape: bf16[16,32], index: 13, kind: output, shape index: {0}]   ;;  %s1376_s14 = inlined_call_operand.hbm [shape: bf16[16,32], index: 14, kind: output, shape index: {1}]   ;;  %s1377_s15 = inlined_call_operand.hbm [shape: bf16[16,32], index: 15, kind: output, shape index: {2}]   ;;  %s1378_s16 = inlined_call_operand.hbm [shape: bf16[16,32], index: 16, kind: output, shape index: {3}]  }
   0x1   :  { %1379 = sst [smem:[#allocation34_spill]] %s1362_s0 }
   0x2   :  { %22 = vsyncpa [#allocation3], 0 }
   0x3   :  { %23 = vsyncpa [#allocation6], 0 }
   0x4   :  { %24 = vsyncpa [#allocation9], 0 }
   0x5   :  { %25 = vsyncpa [#allocation12], 0 }
   0x6   :  { %26 = vsyncpa [#allocation15], 0 }
   0x7   :  { %27 = vsyncpa [#allocation18], 0 }
   0x8   :  { %28 = vsyncpa [#allocation4], 0 }
   0x9   :  { %29 = vsyncpa [#allocation21], 0 }
   0xa   :  { %30 = vsyncpa [#allocation24], 0  ;;  %s1137_s21 = smov [#allocation5]   ;;  %s1138_s23 = smov [#allocation8]  }
   0xb   :  { %s48_s22 = sshll.u32 %s1137_s21, 4  ;;  %s70_s24 = sshll.u32 %s1138_s23, 4  ;;  %s49_s22 = int_to_ptr.vmem [resolvable:$true] %s48_s22  ;;  %s71_s24 = int_to_ptr.vmem [resolvable:$true] %s70_s24 }
   0xc   :  { %s847_s25 = scalar_lea.vmem %s49_s22, 256  ;;  %p852_p1 = scmp.lt.s32.totalorder %s49_s22, %s49_s22 }
   0xd   :  { %p848_p0 = scmp.ne.s32.totalorder %s49_s22, %s847_s25  ;;  %p853_p2 = scmp.lt.s32.totalorder %s847_s25, %s847_s25 }
   0xf   :  { %p854_p3 = por %p853_p2, %p852_p1 }
  0x11   :  { %p855_p4 = pnand %p854_p3, %p848_p0 }
  0x13   :  { %858 = shalt.err (!%p855_p4)
}
  0x14   :  { %s1139_s26 = smov 64   ;;  %s1140_s27 = smov 4  }
  0x15   :  { %54 = dma.hbm_to_vmem [thread:$0]  %s1363_s1, 256, %s49_s22, [#allocation6], %s1139_s26, %s1139_s26, %s1140_s27  }
  0x16   :  { %s867_s30 = scalar_lea.vmem %s71_s24, 256  ;;  %p872_p6 = scmp.lt.s32.totalorder %s71_s24, %s71_s24 }
  0x17   :  { %p868_p5 = scmp.ne.s32.totalorder %s71_s24, %s867_s30  ;;  %p873_p7 = scmp.lt.s32.totalorder %s867_s30, %s867_s30 }
  0x19   :  { %p874_p8 = por %p873_p7, %p872_p6 }
  0x1b   :  { %p875_p9 = pnand %p874_p8, %p868_p5 }
  0x1d   :  { %878 = shalt.err (!%p875_p9)
}
  0x1e   :  { %76 = dma.hbm_to_vmem [thread:$0]  %s1365_s3, 256, %s71_s24, [#allocation9], %s1139_s26, %s1139_s26, %s1140_s27  }
  0x1f   :  { %s1141_s18 = smov [#allocation11]   ;;  %s1142_s20 = smov [#allocation14]  }
  0x20   :  { %s92_s19 = sshll.u32 %s1141_s18, 4  ;;  %s114_s21 = sshll.u32 %s1142_s20, 4  ;;  %s93_s19 = int_to_ptr.vmem [resolvable:$true] %s92_s19  ;;  %s115_s21 = int_to_ptr.vmem [resolvable:$true] %s114_s21 }
  0x21   :  { %s887_s1 = scalar_lea.vmem %s93_s19, 256  ;;  %p892_p11 = scmp.lt.s32.totalorder %s93_s19, %s93_s19 }
  0x22   :  { %p888_p10 = scmp.ne.s32.totalorder %s93_s19, %s887_s1  ;;  %p893_p12 = scmp.lt.s32.totalorder %s887_s1, %s887_s1 }
  0x24   :  { %p894_p13 = por %p893_p12, %p892_p11 }
  0x26   :  { %p895_p0 = pnand %p894_p13, %p888_p10 }
  0x28   :  { %898 = shalt.err (!%p895_p0)
}
  0x29   :  { %98 = dma.hbm_to_vmem [thread:$0]  %s1367_s5, 256, %s93_s19, [#allocation12], %s1139_s26, %s1139_s26, %s1140_s27  }
  0x2a   :  { %s907_s3 = scalar_lea.vmem %s115_s21, 256  ;;  %p912_p2 = scmp.lt.s32.totalorder %s115_s21, %s115_s21 }
  0x2b   :  { %p908_p1 = scmp.ne.s32.totalorder %s115_s21, %s907_s3  ;;  %p913_p3 = scmp.lt.s32.totalorder %s907_s3, %s907_s3 }
  0x2d   :  { %p914_p4 = por %p913_p3, %p912_p2 }
  0x2f   :  { %p915_p5 = pnand %p914_p4, %p908_p1 }
  0x31   :  { %918 = shalt.err (!%p915_p5)
}
  0x32   :  { %120 = dma.hbm_to_vmem [thread:$0]  %s1369_s7, 256, %s115_s21, [#allocation15], %s1139_s26, %s1139_s26, %s1140_s27  }
  0x33   :  { %s1143_s28 = smov [#allocation2]   ;;  %s1144_s30 = smov [#allocation7]  }
  0x34   :  { %s36_s29 = sshll.u32 %s1143_s28, 4  ;;  %s61_s0 = sshll.u32 %s1144_s30, 4  ;;  %s37_s29 = int_to_ptr.vmem [resolvable:$true] %s36_s29  ;;  %s62_s0 = int_to_ptr.vmem [resolvable:$true] %s61_s0 }
  0x35   :  { %s927_s5 = scalar_lea.vmem %s37_s29, 128  ;;  %p932_p7 = scmp.lt.s32.totalorder %s37_s29, %s37_s29 }
  0x36   :  { %p928_p6 = scmp.ne.s32.totalorder %s37_s29, %s927_s5  ;;  %p933_p8 = scmp.lt.s32.totalorder %s927_s5, %s927_s5 }
  0x38   :  { %p934_p9 = por %p933_p8, %p932_p7 }
  0x3a   :  { %p935_p10 = pnand %p934_p9, %p928_p6 }
  0x3c   :  { %938 = shalt.err (!%p935_p10)
}
  0x3d   :  { %s1380_s19 = sld [smem:[#allocation34_spill]]  ;;  %s947_s7 = scalar_lea.vmem %s62_s0, 16 }
  0x3e   :  { %p948_p11 = scmp.ne.s32.totalorder %s62_s0, %s947_s7  ;;  %s951_s20 = scalar_lea.vmem %s62_s0, 32 }
  0x3f   :  { %p952_p12 = scmp.lt.s32.totalorder %s62_s0, %s62_s0  ;;  %p953_p13 = scmp.lt.s32.totalorder %s951_s20, %s947_s7 }
  0x41   :  { %p954_p0 = por %p953_p13, %p952_p12 }
  0x43   :  { %42 = dma.hbm_to_vmem [thread:$0]  %s1380_s19, 128, %s37_s29, [#allocation3], %s1139_s26, %s1139_s26, %s1140_s27  }
  0x44   :  { %p955_p1 = pnand %p954_p0, %p948_p11 }
  0x46   :  { %958 = shalt.err (!%p955_p1)
}
  0x47   :  { %64 = dma.hbm_to_vmem [thread:$0]  %s1364_s2, 16, %s62_s0, [#allocation6]  }
  0x48   :  { %s1145_s22 = smov [#allocation10]   ;;  %s1146_s3 = smov [#allocation13]  }
  0x49   :  { %s83_s23 = sshll.u32 %s1145_s22, 4  ;;  %s105_s24 = sshll.u32 %s1146_s3, 4  ;;  %s84_s23 = int_to_ptr.vmem [resolvable:$true] %s83_s23  ;;  %s106_s24 = int_to_ptr.vmem [resolvable:$true] %s105_s24 }
  0x4a   :  { %s967_s25 = scalar_lea.vmem %s84_s23, 16  ;;  %s971_s28 = scalar_lea.vmem %s84_s23, 32 }
  0x4b   :  { %p968_p2 = scmp.ne.s32.totalorder %s84_s23, %s967_s25  ;;  %p972_p3 = scmp.lt.s32.totalorder %s84_s23, %s84_s23 }
  0x4c   :  { %p973_p4 = scmp.lt.s32.totalorder %s971_s28, %s967_s25 }
  0x4e   :  { %p974_p5 = por %p973_p4, %p972_p3 }
  0x50   :  { %p975_p6 = pnand %p974_p5, %p968_p2 }
  0x52   :  { %978 = shalt.err (!%p975_p6)
}
  0x53   :  { %86 = dma.hbm_to_vmem [thread:$0]  %s1366_s4, 16, %s84_s23, [#allocation9]  }
  0x54   :  { %s987_s5 = scalar_lea.vmem %s106_s24, 16  ;;  %s991_s2 = scalar_lea.vmem %s106_s24, 32 }
  0x55   :  { %p988_p7 = scmp.ne.s32.totalorder %s106_s24, %s987_s5  ;;  %p992_p8 = scmp.lt.s32.totalorder %s106_s24, %s106_s24 }
  0x56   :  { %p993_p9 = scmp.lt.s32.totalorder %s991_s2, %s987_s5 }
  0x58   :  { %p994_p10 = por %p993_p9, %p992_p8 }
  0x5a   :  { %p995_p11 = pnand %p994_p10, %p988_p7 }
  0x5c   :  { %998 = shalt.err (!%p995_p11)
}
  0x5d   :  { %108 = dma.hbm_to_vmem [thread:$0]  %s1368_s6, 16, %s106_s24, [#allocation12]  }
  0x5e   :  { %s1147_s18 = smov [#allocation16]   ;;  %s1148_s7 = smov [#allocation17]  }
  0x5f   :  { %s127_s19 = sshll.u32 %s1147_s18, 4  ;;  %s140_s20 = sshll.u32 %s1148_s7, 4  ;;  %s128_s19 = int_to_ptr.vmem [resolvable:$true] %s127_s19  ;;  %s141_s20 = int_to_ptr.vmem [resolvable:$true] %s140_s20 }
  0x60   :  { %s1007_s21 = scalar_lea.vmem %s128_s19, 16  ;;  %s1011_s4 = scalar_lea.vmem %s128_s19, 32 }
  0x61   :  { %p1008_p12 = scmp.ne.s32.totalorder %s128_s19, %s1007_s21  ;;  %p1012_p13 = scmp.lt.s32.totalorder %s128_s19, %s128_s19 }
  0x62   :  { %p1013_p0 = scmp.lt.s32.totalorder %s1011_s4, %s1007_s21 }
  0x64   :  { %p1014_p1 = por %p1013_p0, %p1012_p13 }
  0x66   :  { %p1015_p2 = pnand %p1014_p1, %p1008_p12 }
  0x68   :  { %1018 = shalt.err (!%p1015_p2)
}
  0x69   :  { %130 = dma.hbm_to_vmem [thread:$0]  %s1370_s8, 16, %s128_s19, [#allocation15]  }
  0x6a   :  { %s1027_s23 = scalar_lea.vmem %s141_s20, 256  ;;  %p1032_p4 = scmp.lt.s32.totalorder %s141_s20, %s141_s20 }
  0x6b   :  { %p1028_p3 = scmp.ne.s32.totalorder %s141_s20, %s1027_s23  ;;  %p1033_p5 = scmp.lt.s32.totalorder %s1027_s23, %s1027_s23 }
  0x6d   :  { %p1034_p6 = por %p1033_p5, %p1032_p4 }
  0x6f   :  { %p1035_p7 = pnand %p1034_p6, %p1028_p3 }
  0x71   :  { %1038 = shalt.err (!%p1035_p7)
}
  0x72   :  { %146 = dma.hbm_to_vmem [thread:$0]  %s1373_s11, 256, %s141_s20, [#allocation18], %s1139_s26, %s1139_s26, %s1140_s27  }
  0x73   :  { %1119 = dma.done.wait [#allocation3], 128  }
  0x74   :  { %1120 = vsyncadd [#allocation3], 4294967168 }
  0x75   :  { %1121 = dma.done.wait [#allocation6], 272  }
  0x76   :  { %1122 = vsyncadd [#allocation6], 4294967024 }
  0x77   :  { %1123 = dma.done.wait [#allocation9], 272  }
  0x78   :  { %1124 = vsyncadd [#allocation9], 4294967024 }
  0x79   :  { %1125 = dma.done.wait [#allocation12], 272  }
  0x7a   :  { %1126 = vsyncadd [#allocation12], 4294967024 }
  0x7b   :  { %1127 = dma.done.wait [#allocation15], 272  }
  0x7c   :  { %1128 = vsyncadd [#allocation15], 4294967024 }
  0x7d   :  { %1129 = dma.done.wait [#allocation18], 256  }
  0x7e   :  { %1130 = vsyncadd [#allocation18], 4294967040  ;;  %v1149_v0 = vmov 0.0   ;;  %vm1150_vm0 = vmmov 0   ;;  %v826_v1 = vld [vmem:[#allocation5 + $0x8] sm:$0xff]   ;;  %v827_v2 = vld [vmem:[#allocation8 + $0x8] sm:$0xff]  }
  0x7f   :  { %760 = vmatprep.subr.bf16.mxu0 %v1149_v0  ;;  %768 = vmatprep.subr.bf16.mxu1 %v1149_v0  ;;  %v828_v3 = vld [vmem:[#allocation5] sm:$0xff]   ;;  %v829_v4 = vld [vmem:[#allocation8] sm:$0xff]   ;;  %vm210_vm1 = vcmask 261120   ;;  %v701_v12 = vld [vmem:[#allocation7] ss:$0 sm:$0xff]  ;;  %vm593_vm2 = vcmask 257024  }
  0x80   :  { %764 = vmatprep.mubr.msk.bf16.mxu0 %vm1150_vm0, %v1149_v0  ;;  %772 = vmatprep.mubr.msk.bf16.mxu1 %vm1150_vm0, %v1149_v0  ;;  %v830_v5 = vld [vmem:[#allocation2] sm:$0xff]   ;;  %v831_v6 = vld [vmem:[#allocation11 + $0x8] sm:$0xff]   ;;  %v833_v8 = vld [vmem:[#allocation11] sm:$0xff]   ;;  %s1151_s29 = smov [#allocation19]   ;;  %s1152_s0 = smov [#allocation20]  }
  0x81   :  { %761 = vmatpush3.bf16.msra.mxu0 %v826_v1  ;;  %769 = vmatpush3.bf16.msra.mxu1 %v827_v2  ;;  %v832_v7 = vld [vmem:[#allocation14 + $0x8] sm:$0xff]   ;;  %v834_v9 = vld [vmem:[#allocation14] sm:$0xff]   ;;  %v837_v28 = vld [vmem:[%s1371_s9] sm:$0xff]   ;;  %s637_s30 = sshll.u32 %s1151_s29, 4  ;;  %s649_s17 = sshll.u32 %s1152_s0, 4  ;;  %s638_s30 = int_to_ptr.vmem [resolvable:$true] %s637_s30  ;;  %s650_s17 = int_to_ptr.vmem [resolvable:$true] %s649_s17 }
  0x82   :  { %762 = vmatprep.subr.bf16.mxu0 %v1149_v0  ;;  %770 = vmatprep.subr.bf16.mxu1 %v1149_v0  ;;  %v706_v14 = vld [vmem:[#allocation10] ss:$0 sm:$0xff]  ;;  %v835_v23 = vld [vmem:[%s1371_s9 + $0x8] sm:$0xff]   ;;  %v838_v29 = vld [vmem:[#allocation17] sm:$0xff]   ;;  %p1044_p9 = scmp.lt.s32.totalorder %s638_s30, %s638_s30 }
  0x83   :  { %v836_v26 = vld [vmem:[#allocation17 + $0x8] sm:$0xff]   ;;  %v714_v31 = vld [vmem:[#allocation16] ss:$0 sm:$0xff]  ;;  %v718_v47 = vld [vmem:[%s1372_s10] ss:$0 sm:$0xff]  ;;  %s1039_s10 = scalar_lea.vmem %s638_s30, 128 }
  0x84   :  { %v710_v30 = vld [vmem:[#allocation13] ss:$0 sm:$0xff]  ;;  %v722_v50 = vld [vmem:[%s1374_s12] ss:$0 sm:$0xff]  ;;  %p1040_p8 = scmp.ne.s32.totalorder %s638_s30, %s1039_s10  ;;  %p1045_p10 = scmp.lt.s32.totalorder %s1039_s10, %s1039_s10 }
  0x85   :  { %763 = vmatpush3.bf16.msra.mxu0 %v828_v3  ;;  %771 = vmatpush3.bf16.msra.mxu1 %v829_v4 }
  0x86   :  { %776 = vmatprep.subr.bf16.mxu0 %v1149_v0  ;;  %784 = vmatprep.subr.bf16.mxu1 %v1149_v0  ;;  %p1046_p11 = por %p1045_p10, %p1044_p9 }
  0x88   :  { %765 = vmatmul.mubr.msk.bf16.vlgmr.msra.gmra.mxu0 %vm210_vm1, %v830_v5  ;;  %773 = vmatmul.mubr.msk.bf16.vlgmr.msra.gmra.mxu1 %vm210_vm1, %v830_v5  ;;  %p1047_p12 = pnand %p1046_p11, %p1040_p8 }
  0x89   :  { %780 = vmatprep.mubr.msk.bf16.mxu0 %vm1150_vm0, %v1149_v0  ;;  %788 = vmatprep.mubr.msk.bf16.mxu1 %vm1150_vm0, %v1149_v0 }
  0x8a   :  { %777 = vmatpush3.bf16.msra.mxu0 %v831_v6  ;;  %785 = vmatpush3.bf16.msra.mxu1 %v832_v7 }
  0x8b   :  { %778 = vmatprep.subr.bf16.mxu0 %v1149_v0  ;;  %786 = vmatprep.subr.bf16.mxu1 %v1149_v0 }
  0x8e   :  { %779 = vmatpush3.bf16.msra.mxu0 %v833_v8  ;;  %787 = vmatpush3.bf16.msra.mxu1 %v834_v9 }
  0x8f   :  { %792 = vmatprep.subr.bf16.mxu0 %v1149_v0  ;;  %800 = vmatprep.subr.bf16.mxu1 %v1149_v0 }
 0x148   :  { %v248_v10 = vpop.f32.mrf.mxu0  ;;  %v312_v11 = vpop.f32.mrf.mxu1 }
 0x149   :  { %v249_v17 = vadd.f32 %v701_v12, %v248_v10  ;;  %v313_v20 = vadd.f32 %v706_v14, %v312_v11 }
 0x14a   :  { %v766_v13 = vpop.f32.mrf.mxu0  ;;  %v774_v15 = vpop.f32.mrf.mxu1 }
 0x14c   :  { %v251_v16 = vpop.f32.mrf.mxu0  ;;  %v315_v19 = vpop.f32.mrf.mxu1 }
 0x14d   :  { %v252_v18 = vadd.f32 %v701_v12, %v251_v16  ;;  %v316_v21 = vadd.f32 %v706_v14, %v315_v19 }
 0x14e   :  { %v767_v22 = vpop.f32.mrf.mxu0  ;;  %v775_v25 = vpop.f32.mrf.mxu1 }
 0x14f   :  { %v319_v24 = vpack.c.bf16 %v252_v18, %v249_v17  ;;  %v320_v27 = vpack.c.bf16 %v316_v21, %v313_v20 }
 0x151   :  { %781 = vmatmul.mubr.msk.bf16.vlgmr.msra.gmra.mxu0 %vm210_vm1, %v319_v24  ;;  %789 = vmatmul.mubr.msk.bf16.vlgmr.msra.gmra.mxu1 %vm210_vm1, %v320_v27 }
 0x152   :  { %793 = vmatpush3.bf16.msra.mxu0 %v835_v23  ;;  %801 = vmatpush3.bf16.msra.mxu1 %v836_v26 }
 0x153   :  { %794 = vmatprep.subr.bf16.mxu0 %v1149_v0  ;;  %802 = vmatprep.subr.bf16.mxu1 %v1149_v0 }
 0x154   :  { %796 = vmatprep.mubr.msk.bf16.mxu0 %vm1150_vm0, %v1149_v0  ;;  %804 = vmatprep.mubr.msk.bf16.mxu1 %vm1150_vm0, %v1149_v0 }
 0x156   :  { %795 = vmatpush3.bf16.msra.mxu0 %v837_v28  ;;  %803 = vmatpush3.bf16.msra.mxu1 %v838_v29 }
 0x159   :  { %797 = vmatmul.mubr.msk.bf16.vlgmr.msra.gmra.mxu0 %vm210_vm1, %v319_v24  ;;  %805 = vmatmul.mubr.msk.bf16.vlgmr.msra.gmra.mxu1 %vm210_vm1, %v320_v27 }
 0x211   :  { %v381_v32 = vpop.f32.mrf.mxu0  ;;  %v448_v34 = vpop.f32.mrf.mxu1 }
 0x212   :  { %v382_v33 = vadd.f32 %v710_v30, %v381_v32  ;;  %v449_v35 = vadd.f32 %v714_v31, %v448_v34 }
 0x213   :  { %v782_v36 = vpop.f32.mrf.mxu0  ;;  %v790_v38 = vpop.f32.mrf.mxu1 }
 0x214   :  { %v583_v37 = vmax.f32 %v382_v33, 0.0  ;;  %v596_v39 = vmax.f32 %v449_v35, 0.0 }
 0x215   :  { %v384_v40 = vpop.f32.mrf.mxu0  ;;  %v451_v43 = vpop.f32.mrf.mxu1 }
 0x216   :  { %v734_v41 = vpack.c.bf16 %v583_v37, %v583_v37  ;;  %v385_v42 = vadd.f32 %v710_v30, %v384_v40  ;;  %v736_v44 = vpack.c.bf16 %v596_v39, %v596_v39  ;;  %v452_v45 = vadd.f32 %v714_v31, %v451_v43 }
 0x217   :  { %v783_v46 = vpop.f32.mrf.mxu0  ;;  %v791_v49 = vpop.f32.mrf.mxu1 }
 0x218   :  { %v584_v48 = vmax.f32 %v385_v42, 0.0  ;;  %594 = vst.msk [vmem:[#allocation19] sm:$0xf] %vm593_vm2, %v734_v41  ;;  %v597_v51 = vmax.f32 %v452_v45, 0.0  ;;  %606 = vst.msk [vmem:[#allocation20] sm:$0xf] %vm593_vm2, %v736_v44 }
 0x219   :  { %v512_v52 = vpop.f32.mrf.mxu0  ;;  %v576_v55 = vpop.f32.mrf.mxu1 }
 0x21a   :  { %v735_v53 = vpack.c.bf16 %v584_v48, %v584_v48  ;;  %v513_v54 = vadd.f32 %v718_v47, %v512_v52  ;;  %v737_v56 = vpack.c.bf16 %v597_v51, %v597_v51  ;;  %v577_v57 = vadd.f32 %v722_v50, %v576_v55 }
 0x21b   :  { %v798_v58 = vpop.f32.mrf.mxu0  ;;  %v806_v60 = vpop.f32.mrf.mxu1 }
 0x21c   :  { %v608_v59 = vmax.f32 %v513_v54, 0.0  ;;  %595 = vst.msk [vmem:[#allocation19 + $0x4] sm:$0xf] %vm593_vm2, %v735_v53  ;;  %v620_v61 = vmax.f32 %v577_v57, 0.0  ;;  %607 = vst.msk [vmem:[#allocation20 + $0x4] sm:$0xf] %vm593_vm2, %v737_v56 }
 0x21d   :  { %v515_v62 = vpop.f32.mrf.mxu0 }
 0x21e   :  { %1050 = shalt.err (!%p1047_p12)
}
 0x21f   :  { %643 = dma.vmem_to_hbm [thread:$0]  %s638_s30, 128, %s1375_s13, [#allocation4], %s1139_s26, %s1139_s26, %s1140_s27   ;;  %v738_v63 = vpack.c.bf16 %v608_v59, %v608_v59  ;;  %v516_v0 = vadd.f32 %v718_v47, %v515_v62  ;;  %v579_v1 = vpop.f32.mrf.mxu1 }
 0x220   :  { %s1059_s19 = scalar_lea.vmem %s650_s17, 128  ;;  %p1064_p0 = scmp.lt.s32.totalorder %s650_s17, %s650_s17 }
 0x221   :  { %p1060_p13 = scmp.ne.s32.totalorder %s650_s17, %s1059_s19  ;;  %p1065_p1 = scmp.lt.s32.totalorder %s1059_s19, %s1059_s19 }
 0x223   :  { %p1066_p2 = por %p1065_p1, %p1064_p0 }
 0x225   :  { %p1067_p3 = pnand %p1066_p2, %p1060_p13 }
 0x227   :  { %1070 = shalt.err (!%p1067_p3)
}
 0x228   :  { %655 = dma.vmem_to_hbm [thread:$0]  %s650_s17, 128, %s1376_s14, [#allocation21], %s1139_s26, %s1139_s26, %s1140_s27   ;;  %v740_v2 = vpack.c.bf16 %v620_v61, %v620_v61  ;;  %v580_v3 = vadd.f32 %v722_v50, %v579_v1  ;;  %v799_v4 = vpop.f32.mrf.mxu0  ;;  %v609_v5 = vmax.f32 %v516_v0, 0.0  ;;  %v807_v6 = vpop.f32.mrf.mxu1  ;;  %618 = vst.msk [vmem:[#allocation22] sm:$0xf] %vm593_vm2, %v738_v63 }
 0x229   :  { %s1153_s13 = smov [#allocation22]   ;;  %s1154_s4 = smov [#allocation23]  }
 0x22a   :  { %s661_s21 = sshll.u32 %s1153_s13, 4  ;;  %s673_s1 = sshll.u32 %s1154_s4, 4  ;;  %v621_v7 = vmax.f32 %v580_v3, 0.0  ;;  %630 = vst.msk [vmem:[#allocation23] sm:$0xf] %vm593_vm2, %v740_v2  ;;  %v739_v8 = vpack.c.bf16 %v609_v5, %v609_v5  ;;  %s662_s21 = int_to_ptr.vmem [resolvable:$true] %s661_s21  ;;  %s674_s1 = int_to_ptr.vmem [resolvable:$true] %s673_s1 }
 0x22b   :  { %s1079_s14 = scalar_lea.vmem %s662_s21, 128  ;;  %p1084_p5 = scmp.lt.s32.totalorder %s662_s21, %s662_s21 }
 0x22c   :  { %v741_v9 = vpack.c.bf16 %v621_v7, %v621_v7  ;;  %619 = vst.msk [vmem:[#allocation22 + $0x4] sm:$0xf] %vm593_vm2, %v739_v8  ;;  %p1080_p4 = scmp.ne.s32.totalorder %s662_s21, %s1079_s14  ;;  %p1085_p6 = scmp.lt.s32.totalorder %s1079_s14, %s1079_s14 }
 0x22e   :  { %631 = vst.msk [vmem:[#allocation23 + $0x4] sm:$0xf] %vm593_vm2, %v741_v9  ;;  %p1086_p7 = por %p1085_p6, %p1084_p5 }
 0x230   :  { %p1087_p8 = pnand %p1086_p7, %p1080_p4 }
 0x232   :  { %1090 = shalt.err (!%p1087_p8)
}
 0x233   :  { %667 = dma.vmem_to_hbm [thread:$0]  %s662_s21, 128, %s1377_s15, [#allocation21], %s1139_s26, %s1139_s26, %s1140_s27  }
 0x234   :  { %s1099_s6 = scalar_lea.vmem %s674_s1, 128  ;;  %p1104_p10 = scmp.lt.s32.totalorder %s674_s1, %s674_s1 }
 0x235   :  { %p1100_p9 = scmp.ne.s32.totalorder %s674_s1, %s1099_s6  ;;  %p1105_p11 = scmp.lt.s32.totalorder %s1099_s6, %s1099_s6 }
 0x237   :  { %p1106_p12 = por %p1105_p11, %p1104_p10 }
 0x239   :  { %p1107_p13 = pnand %p1106_p12, %p1100_p9 }
 0x23b   :  { %1110 = shalt.err (!%p1107_p13)
}
 0x23c   :  { %679 = dma.vmem_to_hbm [thread:$0]  %s674_s1, 128, %s1378_s16, [#allocation24], %s1139_s26, %s1139_s26, %s1140_s27  }
 0x23d   :  { %1131 = dma.done.wait [#allocation4], 128  }
 0x23e   :  { %1132 = vsyncadd [#allocation4], 4294967168 }
 0x23f   :  { %1133 = dma.done.wait [#allocation21], 256  }
 0x240   :  { %1134 = vsyncadd [#allocation21], 4294967040 }
 0x241   :  { %1135 = dma.done.wait [#allocation24], 128  }
 0x242   :  { %1136 = vsyncadd [#allocation24], 4294967168 }
 0x243   :  { %692 = vsyncpa [#allocation3], 1 }
 0x244   :  { %693 = vsyncpa [#allocation6], 1 }
 0x245   :  { %694 = vsyncpa [#allocation9], 1 }
 0x246   :  { %695 = vsyncpa [#allocation12], 1 }
 0x247   :  { %696 = vsyncpa [#allocation15], 1 }
 0x248   :  { %697 = vsyncpa [#allocation18], 1 }
 0x249   :  { %698 = vsyncpa [#allocation4], 1 }
 0x24a   :  { %699 = vsyncpa [#allocation21], 1 }
 0x24b   :  { %700 = vsyncpa [#allocation24], 1 }

</bundles_post_ra>
